<compile_context>
chip_gen: v6e
topology: v6e:2x2x1
jax: 0.10.0
libtpu: 0.0.40
codegen_flags: <defaults>
</compile_context>

<pallas_src>
import math
import functools

import jax
import jax.numpy as jnp
from jax import lax
from jax.experimental import pallas as pl
from jax.experimental.pallas import tpu as pltpu


_TB_MAX = 1024  # batch rows per grid step (keeps per-step VMEM < ~1 MiB)


# ---------------------------------------------------------------------------
# Kernel: one grid step processes a (TB, 1) batch tile against the resident
# packed parameter block.
# ---------------------------------------------------------------------------
def _fused_kernel(s_ref,        # SMEM (1, 3)   [offset, b_mu, b_var]
                  x_ref,        # VMEM (TB, 1)  input tile
                  p_ref,        # VMEM (W+16, W) packed parameters
                  out_ref):     # VMEM (TB, 2)  [mu | var]
    W = p_ref.shape[1]
    x = x_ref[...]                                    # (TB, 1)

    w0 = p_ref[W + 0:W + 1, :]                        # (1, W) layer-0 weights
    b0 = p_ref[W + 1:W + 2, :]                        # (1, W) layer-0 biases
    b1 = p_ref[W + 2:W + 3, :]                        # (1, W) layer-1 biases
    w2 = p_ref[W + 8:W + 16, :]                       # (8, W) rows 0/1 = mu/var proj

    # Layer 0 (K=1): VPU broadcast multiply-add, no MXU.
    h0 = jnp.tanh(x * w0 + b0)                        # (TB, W)

    # Layer 1: single MXU pass over the fused block-diagonal weight.
    h1 = jnp.tanh(jnp.dot(h0, p_ref[0:W, :],
                          preferred_element_type=jnp.float32) + b1)   # (TB, W)

    # Final projections: one more MXU pass (transposed 8-row RHS) instead of
    # per-branch VPU mul + XLU lane reductions + concatenate.
    proj = lax.dot_general(h1, w2, (((1,), (1,)), ((), ())),
                           preferred_element_type=jnp.float32)        # (TB, 8)

    offset = s_ref[0, 0]
    b_mu = s_ref[0, 1]
    b_var = s_ref[0, 2]

    lane = lax.broadcasted_iota(jnp.int32, proj.shape, 1)
    is_var = lane == 1
    z = proj + jnp.where(is_var, b_var, b_mu)         # scalar (SMEM) bias adds

    # Stable softplus + runtime offset, applied only on the var lane.
    sp = jnp.maximum(z, 0.0) + jnp.log1p(jnp.exp(-jnp.abs(z))) + offset
    res = jnp.where(is_var, sp, z)

    out_ref[...] = res[:, 0:2]                        # (TB, 2) [mu | var]


# ---------------------------------------------------------------------------
# One-time parameter packing (call when the weights change, NOT per forward).
# Weights are stored (in, out); biases (1, out).
# ---------------------------------------------------------------------------
def pack_params(params):
    w0, b0, w1, b1, wmu, bmu, v0, c0, v1, c1, wvar, bvar = [
        p.astype(jnp.float32) for p in params]
    hmu0, hmu1 = w1.shape
    hvar0, hvar1 = v1.shape
    W = max(hmu0 + hvar0, hmu1 + hvar1)

    P = jnp.zeros((W + 16, W), jnp.float32)
    # Fused block-diagonal hidden layer: [W1 | 0 ; 0 | V1]
    P = P.at[:hmu0, :hmu1].set(w1)
    P = P.at[hmu0:hmu0 + hvar0, hmu1:hmu1 + hvar1].set(v1)
    # Layer-0 weights / biases (layer-0 output lane layout).
    P = P.at[W + 0, :hmu0].set(w0[0])
    P = P.at[W + 0, hmu0:hmu0 + hvar0].set(v0[0])
    P = P.at[W + 1, :hmu0].set(b0[0])
    P = P.at[W + 1, hmu0:hmu0 + hvar0].set(c0[0])
    # Layer-1 biases (layer-1 output lane layout).
    P = P.at[W + 2, :hmu1].set(b1[0])
    P = P.at[W + 2, hmu1:hmu1 + hvar1].set(c1[0])
    # Final projection rows (sublane-aligned 8-row block for the MXU pass).
    P = P.at[W + 8, :hmu1].set(wmu[:, 0])
    P = P.at[W + 9, hmu1:hmu1 + hvar1].set(wvar[:, 0])

    bias2 = jnp.stack([bmu[0, 0], bvar[0, 0]]).astype(jnp.float32)  # (2,)
    return P, bias2


# ---------------------------------------------------------------------------
# Forward wrapper (jitted).  episode_num is a traced runtime value, so
# changing it does not recompile.
# ---------------------------------------------------------------------------
def _forward_impl(x, packed, bias2, episode_num):
    B = x.shape[0]
    Wp, W = packed.shape

    offset = 5.0 * jnp.exp(-jnp.asarray(episode_num, jnp.float32) / 100.0)
    scalars = jnp.concatenate([offset.reshape(1), bias2]).reshape(1, 3)

    x = x.astype(jnp.float32)
    if B <= _TB_MAX:
        TB, Bp = B, B
    else:
        TB = _TB_MAX
        Bp = ((B + TB - 1) // TB) * TB
        if Bp != B:
            x = jnp.pad(x, ((0, Bp - B), (0, 0)))
    nb = Bp // TB

    out = pl.pallas_call(
        _fused_kernel,
        out_shape=jax.ShapeDtypeStruct((Bp, 2), jnp.float32),
        grid=(nb,),
        in_specs=[
            pl.BlockSpec(memory_space=pltpu.MemorySpace.SMEM),      # scalars
            pl.BlockSpec((TB, 1), lambda i: (i, 0)),                # x tile
            pl.BlockSpec((Wp, W), lambda i: (0, 0)),                # params (resident)
        ],
        out_specs=pl.BlockSpec((TB, 2), lambda i: (i, 0)),
        compiler_params=pltpu.CompilerParams(
            dimension_semantics=("parallel",)),
    )(scalars, x, packed)

    out = out[:B]
    # TODO(synk): for very large B, switch to a (2, B) lane-dense output
    # layout to avoid masked 2-lane stores per tile.
    return out[:, 0:1], out[:, 1:2]


state_transition_forward = jax.jit(_forward_impl)


# ---------------------------------------------------------------------------
# Deterministic parameter initialization (mirrors the PyTorch __init__):
#   Linear(1,H), Linear(H,H), Linear(H,1) per branch; weights xavier_uniform,
#   biases torch-default uniform(+-1/sqrt(fan_in)). Stored as (in, out).
# ---------------------------------------------------------------------------
def _xavier_uniform(key, fan_in, fan_out):
    limit = math.sqrt(6.0 / (fan_in + fan_out))
    return jax.random.uniform(key, (fan_in, fan_out), jnp.float32,
                              minval=-limit, maxval=limit)


def _bias(key, fan_in, fan_out):
    limit = 1.0 / math.sqrt(fan_in)
    return jax.random.uniform(key, (1, fan_out), jnp.float32,
                              minval=-limit, maxval=limit)


def init_params(key, num_hidden_mu, num_hidden_var):
    params = []
    dims_mu = [1] + list(num_hidden_mu) + [1]
    dims_var = [1] + list(num_hidden_var) + [1]
    for dims in (dims_mu, dims_var):
        for i in range(len(dims) - 1):
            key, kw, kb = jax.random.split(key, 3)
            params.append(_xavier_uniform(kw, dims[i], dims[i + 1]))
            params.append(_bias(kb, dims[i], dims[i + 1]))
    return params


# Pure-JAX reference for correctness checking.
def _reference(x, params, episode_num=600):
    w0, b0, w1, b1, wmu, bmu, v0, c0, v1, c1, wvar, bvar = params
    h = jnp.tanh(x @ w0 + b0)
    h = jnp.tanh(h @ w1 + b1)
    mu = h @ wmu + bmu
    g = jnp.tanh(x @ v0 + c0)
    g = jnp.tanh(g @ v1 + c1)
    var = jax.nn.softplus(g @ wvar + bvar) + 5.0 * math.exp(-episode_num / 100.0)
    return mu, var


if __name__ == "__main__":
    key = jax.random.PRNGKey(0)
    kx, kp = jax.random.split(key)

    B = 8
    num_hidden_mu = [32, 32]
    num_hidden_var = [32, 32]

    x = jax.random.normal(kx, (B, 1), jnp.float32)
    params = init_params(kp, num_hidden_mu, num_hidden_var)

    # Pack once; reused across every forward call (out of the hot path).
    packed, bias2 = pack_params(params)
    packed = jax.block_until_ready(packed)

    mu, var = state_transition_forward(x, packed, bias2, 600)
    mu = jax.block_until_ready(mu)
    var = jax.block_until_ready(var)

    mu_ref, var_ref = _reference(x, params, episode_num=600)
    assert mu.shape == (B, 1) and var.shape == (B, 1)
    assert jnp.allclose(mu, mu_ref, atol=1e-5, rtol=1e-5)
    assert jnp.allclose(var, var_ref, atol=1e-5, rtol=1e-5)

    # Different episode_num reuses the same compiled kernel (runtime scalar).
    mu2, var2 = state_transition_forward(x, packed, bias2, 100)
    jax.block_until_ready(var2)
    mu2_ref, var2_ref = _reference(x, params, episode_num=100)
    assert jnp.allclose(mu2, mu2_ref, atol=1e-5, rtol=1e-5)
    assert jnp.allclose(var2, var2_ref, atol=1e-5, rtol=1e-5)

    print("KERNEL_OK")
</pallas_src>

<mosaic_0001>
module attributes {stable_mosaic.version = 11 : i64} {
  func.func @_fused_kernel(%arg0: i32, %arg1: memref<1x3xf32, #tpu.memory_space<smem>>, %arg2: memref<8x1xf32, #tpu.memory_space<vmem>>, %arg3: memref<80x64xf32, #tpu.memory_space<vmem>>, %arg4: memref<8x2xf32, #tpu.memory_space<vmem>>) attributes {dimension_semantics = [#tpu.dimension_semantics<parallel>], iteration_bounds = array<i64: 1>, scalar_prefetch = 0 : i64, scratch_operands = 0 : i64, tpu.core_type = #tpu.core_type<tc>, window_params = [{transform_indices = @transform_0, window_bounds = array<i64: 1, 3>}, {transform_indices = @transform_1, window_bounds = array<i64: 8, 1>}, {pipeline_mode = #tpu.pipeline_mode<synchronous>, transform_indices = @transform_2, window_bounds = array<i64: 80, 64>}, {transform_indices = @transform_3, window_bounds = array<i64: 8, 2>}]} {
    %c0 = arith.constant 0 : index
    %c0_0 = arith.constant 0 : index
    %0 = vector.load %arg2[%c0, %c0_0] : memref<8x1xf32, #tpu.memory_space<vmem>>, vector<8x1xf32>
    %c64 = arith.constant 64 : index
    %c0_1 = arith.constant 0 : index
    %1 = vector.load %arg3[%c64, %c0_1] : memref<80x64xf32, #tpu.memory_space<vmem>>, vector<1x64xf32>
    %c65 = arith.constant 65 : index
    %c0_2 = arith.constant 0 : index
    %2 = vector.load %arg3[%c65, %c0_2] : memref<80x64xf32, #tpu.memory_space<vmem>>, vector<1x64xf32>
    %c66 = arith.constant 66 : index
    %c0_3 = arith.constant 0 : index
    %3 = vector.load %arg3[%c66, %c0_3] : memref<80x64xf32, #tpu.memory_space<vmem>>, vector<1x64xf32>
    %c72 = arith.constant 72 : index
    %c0_4 = arith.constant 0 : index
    %4 = vector.load %arg3[%c72, %c0_4] : memref<80x64xf32, #tpu.memory_space<vmem>>, vector<8x64xf32>
    %5 = vector.broadcast %0 : vector<8x1xf32> to vector<8x64xf32>
    %6 = vector.broadcast %1 : vector<1x64xf32> to vector<8x64xf32>
    %7 = arith.mulf %5, %6 : vector<8x64xf32>
    %8 = vector.broadcast %2 : vector<1x64xf32> to vector<8x64xf32>
    %9 = arith.addf %7, %8 : vector<8x64xf32>
    %10 = math.tanh %9 : vector<8x64xf32>
    %c0_5 = arith.constant 0 : index
    %c0_6 = arith.constant 0 : index
    %11 = vector.load %arg3[%c0_5, %c0_6] : memref<80x64xf32, #tpu.memory_space<vmem>>, vector<64x64xf32>
    %cst = arith.constant dense<0.000000e+00> : vector<8x64xf32>
    %12 = tpu.matmul %10, %11, %cst {dimension_numbers = #tpu.dot_dimension_numbers<[1], [0], [0], [1], [0, 0, 1, 1], [], []>} : vector<8x64xf32>, vector<64x64xf32>, vector<8x64xf32> -> vector<8x64xf32>
    %13 = vector.broadcast %3 : vector<1x64xf32> to vector<8x64xf32>
    %14 = arith.addf %12, %13 : vector<8x64xf32>
    %15 = math.tanh %14 : vector<8x64xf32>
    %cst_7 = arith.constant dense<0.000000e+00> : vector<8x8xf32>
    %16 = tpu.matmul %15, %4, %cst_7 {dimension_numbers = #tpu.dot_dimension_numbers<[1], [1], [0], [0], [0, 0, 1, 0], [], []>} : vector<8x64xf32>, vector<8x64xf32>, vector<8x8xf32> -> vector<8x8xf32>
    %c0_8 = arith.constant 0 : index
    %c0_9 = arith.constant 0 : index
    %17 = memref.load %arg1[%c0_8, %c0_9] : memref<1x3xf32, #tpu.memory_space<smem>>
    %c0_10 = arith.constant 0 : index
    %c1 = arith.constant 1 : index
    %18 = memref.load %arg1[%c0_10, %c1] : memref<1x3xf32, #tpu.memory_space<smem>>
    %c0_11 = arith.constant 0 : index
    %c2 = arith.constant 2 : index
    %19 = memref.load %arg1[%c0_11, %c2] : memref<1x3xf32, #tpu.memory_space<smem>>
    %20 = tpu.iota {dimensions = array<i32: 1>} : vector<8x8xi32>
    %c1_i32 = arith.constant 1 : i32
    %21 = vector.broadcast %c1_i32 : i32 to vector<8x8xi32>
    %22 = arith.cmpi eq, %20, %21 : vector<8x8xi32>
    %23 = vector.broadcast %19 : f32 to vector<8x8xf32>
    %24 = vector.broadcast %18 : f32 to vector<8x8xf32>
    %25 = arith.select %22, %23, %24 : vector<8x8xi1>, vector<8x8xf32>
    %26 = arith.addf %16, %25 : vector<8x8xf32>
    %cst_12 = arith.constant 0.000000e+00 : f32
    %27 = vector.broadcast %cst_12 : f32 to vector<8x8xf32>
    %28 = arith.maximumf %26, %27 : vector<8x8xf32>
    %29 = math.absf %26 : vector<8x8xf32>
    %cst_13 = arith.constant 0.000000e+00 : f32
    %30 = vector.broadcast %cst_13 : f32 to vector<8x8xf32>
    %31 = arith.subf %30, %29 : vector<8x8xf32>
    %32 = math.exp %31 : vector<8x8xf32>
    %33 = math.log1p %32 : vector<8x8xf32>
    %34 = arith.addf %28, %33 : vector<8x8xf32>
    %35 = vector.broadcast %17 : f32 to vector<8x8xf32>
    %36 = arith.addf %34, %35 : vector<8x8xf32>
    %37 = arith.select %22, %36, %26 : vector<8x8xi1>, vector<8x8xf32>
    %38 = vector.extract_strided_slice %37 {offsets = [0, 0], sizes = [8, 2], strides = [1, 1]} : vector<8x8xf32> to vector<8x2xf32>
    %c0_14 = arith.constant 0 : index
    %c0_15 = arith.constant 0 : index
    %39 = vector.load %arg4[%c0_14, %c0_15] : memref<8x2xf32, #tpu.memory_space<vmem>>, vector<8x2xf32>
    tpu.vector_store %arg4[%c0_14, %c0_15], %38 {strides = array<i32>} : memref<8x2xf32, #tpu.memory_space<vmem>>, vector<8x2xf32>,
    return
  }
  func.func @transform_0(%arg0: i32) -> (i32, i32) {
    %c0_i32 = arith.constant 0 : i32
    %c0_i32_0 = arith.constant 0 : i32
    %c0_i32_1 = arith.constant 0 : i32
    return %c0_i32, %c0_i32_0 : i32, i32
  }
  func.func @transform_1(%arg0: i32) -> (i32, i32) {
    %c0_i32 = arith.constant 0 : i32
    %c0_i32_0 = arith.constant 0 : i32
    return %arg0, %c0_i32 : i32, i32
  }
  func.func @transform_2(%arg0: i32) -> (i32, i32) {
    %c0_i32 = arith.constant 0 : i32
    %c0_i32_0 = arith.constant 0 : i32
    %c0_i32_1 = arith.constant 0 : i32
    return %c0_i32, %c0_i32_0 : i32, i32
  }
  func.func @transform_3(%arg0: i32) -> (i32, i32) {
    %c0_i32 = arith.constant 0 : i32
    %c0_i32_0 = arith.constant 0 : i32
    return %arg0, %c0_i32 : i32, i32
  }
}

</mosaic_0001>

<bundles_post_ra>
// kernel: _forward_impl.1
= control target key start
LH: loop header
LB: loop body
LE: loop exit
PB: predicated region body
PF: predicated region fallthrough
CT: control target
= control target key end

     0   :  { %8 = vsyncpa [#allocation3], 0  ;;  %s386_s0 = inlined_call_operand.vmem [shape: f32[1,3], index: 0, kind: input, shape index: {}]   ;;  %s387_s1 = inlined_call_operand.vmem [shape: f32[8,1], index: 1, kind: input, shape index: {}]   ;;  %s388_s2 = inlined_call_operand.vmem [shape: f32[80,64], index: 2, kind: input, shape index: {}]   ;;  %s389_s3 = inlined_call_operand.vmem [shape: f32[8,2], index: 3, kind: output, shape index: {}]  }
   0x1   :  { %s15_s14 = sshll.u32 %s386_s0, 4  ;;  %s16_s14 = int_to_ptr.vmem [resolvable:$true] %s15_s14 }
   0x2   :  { %s301_s15 = scalar_lea.vmem %s16_s14, 16  ;;  %p306_p1 = scmp.lt.s32.totalorder %s16_s14, %s16_s14 }
   0x3   :  { %p302_p0 = scmp.ne.s32.totalorder %s16_s14, %s301_s15  ;;  %p307_p2 = scmp.lt.s32.totalorder %s301_s15, %s301_s15 }
   0x5   :  { %p308_p3 = por %p307_p2, %p306_p1 }
   0x7   :  { %p309_p4 = pnand %p308_p3, %p302_p0 }
   0x9   :  { %312 = shalt.err (!%p309_p4)
}
   0xa   :  { %s315_s16 = smov [#allocation2]  }
   0xb   :  { %18 = dma.vmem_to_smem %s16_s14, 16, %s315_s16, [#allocation3]  }
   0xc   :  { %313 = dma.done.wait [#allocation3], 16  }
   0xd   :  { %314 = vsyncadd [#allocation3], 4294967280 }
   0xe   :  { %26 = sfence }
   0xf   :  { %v27_v0 = vld [vmem:[%s387_s1] sm:$0xff]  ;;  %v316_v1 = vmov 0   ;;  %v55_v2 = vld [vmem:[%s388_s2 + $0x38] sm:$0xff]  ;;  %v317_v3 = vmov 0.0   ;;  %v54_v4 = vld [vmem:[%s388_s2 + $0x30] sm:$0xff]  ;;  %vm318_vm0 = vmmov 0   ;;  %v138_v23 = vlaneseq }
  0x10   :  { %292 = vset.pattern.permute.xlu0 %v316_v1  ;;  %264 = vmatprep.subr.mxu0 %v317_v3  ;;  %v53_v5 = vld [vmem:[%s388_s2 + $0x28] sm:$0xff]  ;;  %v52_v6 = vld [vmem:[%s388_s2 + $0x20] sm:$0xff]  ;;  %v51_v7 = vld [vmem:[%s388_s2 + $0x18] sm:$0xff]  ;;  %vm60_vm1 = vcmask 523264   ;;  %s249_s14 = sld [smem:[#allocation2 + $0x1]]  ;;  %vm238_vm4 = vcmask 15360  }
  0x11   :  { %34 = vperm.xlu0 %292, %v27_v0   ;;  %265 = vmatpush3.msra.mxu0 %v55_v2  ;;  %v50_v8 = vld [vmem:[%s388_s2 + $0x10] sm:$0xff]  ;;  %v49_v9 = vld [vmem:[%s388_s2 + $0x8] sm:$0xff]  ;;  %v48_v10 = vld [vmem:[%s388_s2] sm:$0xff]  ;;  %s250_s15 = sld [smem:[#allocation2 + $0x2]]  ;;  %v139_v24 = vand.u32 127, %v138_v23 }
  0x12   :  { %280 = vmatprep.mubr.msk.f32.mxu0 %vm318_vm0, %v317_v3  ;;  %266 = vmatprep.subr.mxu0 %v317_v3  ;;  %v245_v11 = vld [vmem:[%s388_s2 + $0x40] ss:$0 sm:$0xff]  ;;  %v246_v12 = vld [vmem:[%s388_s2 + $0x41] ss:$0 sm:$0xff]  ;;  %v31_v17 = vld [vmem:[%s388_s2 + $0x48] sm:$0xff] }
  0x13   :  { %283 = vmatprep.subr.mxu1 %v317_v3  ;;  %267 = vmatpush3.msra.mxu0 %v54_v4  ;;  %v247_v18 = vld [vmem:[%s388_s2 + $0x42] ss:$0 sm:$0xff]  ;;  %vm140_vm2 = vcmp.eq.s32.totalorder %v139_v24, 1  ;;  %s135_s2 = sld [smem:[#allocation2]] }
  0x14   :  { %285 = vmatprep.mubr.msk.f32.mxu1 %vm318_vm0, %v317_v3  ;;  %268 = vmatprep.subr.mxu0 %v317_v3 }
  0x15   :  { %269 = vmatpush3.msra.mxu0 %v53_v5  ;;  %284 = vmatpush3.xpose.msk.msra.mxu1 %vm60_vm1, %v31_v17 }
  0x16   :  { %270 = vmatprep.subr.mxu0 %v317_v3  ;;  %v142_v26 = vstv %s249_s14 }
  0x17   :  { %271 = vmatpush3.msra.mxu0 %v52_v6  ;;  %v141_v25 = vstv %s250_s15 }
  0x18   :  { %272 = vmatprep.subr.mxu0 %v317_v3  ;;  %v143_v27 = vsel %vm140_vm2, %v141_v25, %v142_v26 }
  0x19   :  { %273 = vmatpush3.msra.mxu0 %v51_v7  ;;  %v235_v44 = vstv %s135_s2 }
  0x1a   :  { %274 = vmatprep.subr.mxu0 %v317_v3 }
  0x1b   :  { %275 = vmatpush3.msra.mxu0 %v50_v8 }
  0x1c   :  { %276 = vmatprep.subr.mxu0 %v317_v3 }
  0x1d   :  { %277 = vmatpush3.msra.mxu0 %v49_v9 }
  0x1e   :  { %278 = vmatprep.subr.mxu0 %v317_v3 }
  0x1f   :  { %279 = vmatpush3.msra.mxu0 %v48_v10 }
  0x8c   :  { %v35_v13 = vpop.permute.xlu0 %34 }
  0x8d   :  { %v41_v14 = vmul.f32 %v245_v11, %v35_v13 }
  0x8f   :  { %v46_v15 = vadd.f32 %v246_v12, %v41_v14 }
  0x91   :  { %293 = vtanh.f32 %v46_v15 }
  0x9e   :  { %v294_v16 = vpop.eup %293 }
  0x9f   :  { %281 = vmatmul.mubr.msk.f32.vlgmr.msra.gmra.mxu0 %vm60_vm1, %v294_v16 }
 0x15f   :  { %v130_v19 = vpop.f32.mrf.mxu0 }
 0x160   :  { %v131_v20 = vadd.f32 %v247_v18, %v130_v19 }
 0x161   :  { %v282_v21 = vpop.f32.mrf.mxu0 }
 0x162   :  { %295 = vtanh.f32 %v131_v20 }
 0x16f   :  { %v296_v22 = vpop.eup %295 }
 0x170   :  { %286 = vmatmul.mubr.msk.f32.vlgmr.msra.gmra.mxu1 %vm60_vm1, %v296_v22 }
 0x230   :  { %v216_v28 = vpop.f32.mrf.mxu1 }
 0x231   :  { %v217_v29 = vadd.f32 %v216_v28, %v143_v27 }
 0x232   :  { %v287_v30 = vpop.f32.mrf.mxu1 }
 0x233   :  { %v221_v31 = vand.u32 2147483647, %v217_v29  ;;  %v220_v42 = vmax.f32 %v217_v29, 0.0 }
 0x235   :  { %v222_v32 = vsub.f32 0.0, %v221_v31 }
 0x237   :  { %v223_v33 = vmul.f32 1.442695, %v222_v32 }
 0x239   :  { %297 = vpow2.f32 %v223_v33 }
 0x246   :  { %v298_v34 = vpop.eup %297 }
 0x247   :  { %v225_v35 = vadd.f32 1.0, %v298_v34  ;;  %v228_v36 = vmul.f32 -0.5, %v298_v34  ;;  %v231_v38 = vand.u32 2147483647, %v298_v34 }
 0x249   :  { %299 = vlog2.f32 %v225_v35  ;;  %v229_v37 = vadd.f32 1.0, %v228_v36  ;;  %vm232_vm3 = vcmp.lt.f32.partialorder %v231_v38, 0.0004427343 }
 0x24b   :  { %v230_v41 = vmul.f32 %v298_v34, %v229_v37 }
 0x256   :  { %v300_v39 = vpop.eup %299 }
 0x257   :  { %v227_v40 = vmul.f32 0.6931472, %v300_v39 }
 0x259   :  { %v233_v43 = vsel %vm232_vm3, %v230_v41, %v227_v40 }
 0x25a   :  { %v234_v45 = vadd.f32 %v233_v43, %v220_v42 }
 0x25c   :  { %v236_v46 = vadd.f32 %v235_v44, %v234_v45 }
 0x25e   :  { %v237_v47 = vsel %vm140_vm2, %v236_v46, %v217_v29 }
 0x25f   :  { %239 = vst.msk [vmem:[%s389_s3] sm:$0xff] %vm238_vm4, %v237_v47 }
 0x260   :  { %244 = vsyncpa [#allocation3], 1 }

</bundles_post_ra>
